<compile_context>
chip_gen: v5e
topology: v5e:2x2
jax: 0.10.0
libtpu: 0.0.40
codegen_flags: <defaults>
</compile_context>

<pallas_src>
import jax
import jax.numpy as jnp
from jax import lax
from jax.experimental import pallas as pl
from jax.experimental.pallas import tpu as pltpu


def ranker_emb_kernel(qid_ref, did_ref, emb_ref, out_ref, q_buf, d_buf):
    """One grid step = one batch tile of TB examples.

    qid_ref / did_ref : (B_pad,) int32 in SMEM (scalar prefetch).
    emb_ref           : (V, D) embedding table, fully resident in VMEM.
    out_ref           : (1, TB) lane-dense score row for this tile.
    q_buf / d_buf     : (TB, D) f32 VMEM scratch holding the gathered rows.
    """
    tb, d = q_buf.shape
    base = pl.program_id(0) * tb

    def gather(b, carry):
        # Dynamic-sublane row gather from the VMEM-resident table.
        q_buf[pl.ds(b, 1), :] = emb_ref[pl.ds(qid_ref[base + b], 1), :].astype(jnp.float32)
        d_buf[pl.ds(b, 1), :] = emb_ref[pl.ds(did_ref[base + b], 1), :].astype(jnp.float32)
        return carry

    lax.fori_loop(0, tb, gather, 0, unroll=min(tb, 8))

    prod = q_buf[...] * d_buf[...]                      # (TB, D) f32 on the VPU
    ones_row = jnp.ones((1, d), jnp.float32)
    # MXU reduction: contract D of ones(1,D) with D of prod(TB,D) -> (1, TB),
    # already lane-dense, so the store is a single row write per tile.
    out_ref[...] = jnp.einsum("kd,nd->kn", ones_row, prod,
                              preferred_element_type=jnp.float32)


def ranker_emb_forward(emb_table, qid, did):
    """emb_table: (V, D) f32, qid/did: (B,) int32 -> (B,) f32 scores."""
    B = qid.shape[0]
    V, D = emb_table.shape

    # Batch tiling: whole batch in one step when B <= 128, else 128-wide tiles
    # (keeps the (1, TB) output block legal: TB == full dim or TB % 128 == 0).
    if B <= 128:
        tb = ((B + 7) // 8) * 8
        b_pad = tb
    else:
        tb = 128
        b_pad = ((B + 127) // 128) * 128

    if b_pad != B:
        qid = jnp.pad(qid, (0, b_pad - B))
        did = jnp.pad(did, (0, b_pad - B))
    num_tiles = b_pad // tb

    grid_spec = pltpu.PrefetchScalarGridSpec(
        num_scalar_prefetch=2,          # qid, did land in SMEM
        grid=(num_tiles,),
        in_specs=[
            # Whole table, resident in VMEM; same block every step -> one DMA.
            pl.BlockSpec((V, D), lambda t, qids, dids: (0, 0)),
        ],
        # Lane-dense (1, TB) score row per tile.
        out_specs=pl.BlockSpec((1, tb), lambda t, qids, dids: (0, t)),
        scratch_shapes=[
            pltpu.VMEM((tb, D), jnp.float32),   # gathered q rows
            pltpu.VMEM((tb, D), jnp.float32),   # gathered d rows
        ],
    )

    out = pl.pallas_call(
        ranker_emb_kernel,
        out_shape=jax.ShapeDtypeStruct((1, b_pad), jnp.float32),
        grid_spec=grid_spec,
        compiler_params=pltpu.CompilerParams(
            dimension_semantics=("parallel",)),
    )(qid, did, emb_table)

    return out[0, :B]


if __name__ == "__main__":
    # Deterministic synthetic parameters / inputs.
    # config = {'embsize': 128, 'hidden_dim': 32}; vocab (id2emb rows) = 64.
    V, D, B = 64, 128, 8
    key = jax.random.PRNGKey(0)
    k_emb, k_q, k_d = jax.random.split(key, 3)

    # Deterministic stand-in for graph_ember.content_encoder.id2emb.
    emb_table = jax.random.normal(k_emb, (V, D), dtype=jnp.float32)
    qid = jax.random.randint(k_q, (B,), 0, V, dtype=jnp.int32)
    did = jax.random.randint(k_d, (B,), 0, V, dtype=jnp.int32)

    y_pred = jax.block_until_ready(ranker_emb_forward(emb_table, qid, did))

    # Pure-JAX reference of the PyTorch forward.
    y_ref = jnp.sum(emb_table[qid] * emb_table[did], axis=1)
    assert y_pred.shape == (B,)
    assert jnp.allclose(y_pred, y_ref, atol=1e-4, rtol=1e-4), (y_pred, y_ref)

    print("KERNEL_OK")
</pallas_src>

<mosaic_0001>
module attributes {stable_mosaic.version = 11 : i64} {
  func.func @ranker_emb_kernel(%arg0: i32, %arg1: memref<8xi32, #tpu.memory_space<smem>>, %arg2: memref<8xi32, #tpu.memory_space<smem>>, %arg3: memref<64x128xf32, #tpu.memory_space<vmem>>, %arg4: memref<1x8xf32, #tpu.memory_space<vmem>>, %arg5: memref<8x128xf32, #tpu.memory_space<vmem>>, %arg6: memref<8x128xf32, #tpu.memory_space<vmem>>) attributes {dimension_semantics = [#tpu.dimension_semantics<parallel>], iteration_bounds = array<i64: 1>, scalar_prefetch = 2 : i64, scratch_operands = 2 : i64, tpu.core_type = #tpu.core_type<tc>, window_params = [{pipeline_mode = #tpu.pipeline_mode<synchronous>, transform_indices = @transform_0, window_bounds = array<i64: 64, 128>}, {transform_indices = @transform_1, window_bounds = array<i64: 1, 8>}]} {
    %c8_i32 = arith.constant 8 : i32
    %0 = arith.muli %arg0, %c8_i32 : i32
    %c0_i32 = arith.constant 0 : i32
    %1 = arith.addi %0, %c0_i32 : i32
    %2 = arith.index_cast %1 : i32 to index
    %3 = memref.load %arg1[%2] : memref<8xi32, #tpu.memory_space<smem>>
    %4 = arith.index_cast %3 : i32 to index
    %c0 = arith.constant 0 : index
    %5 = vector.load %arg3[%4, %c0] : memref<64x128xf32, #tpu.memory_space<vmem>>, vector<1x128xf32>
    %6 = arith.index_cast %c0_i32 : i32 to index
    %c0_0 = arith.constant 0 : index
    %7 = vector.load %arg5[%6, %c0_0] : memref<8x128xf32, #tpu.memory_space<vmem>>, vector<1x128xf32>
    tpu.vector_store %arg5[%6, %c0_0], %5 {strides = array<i32>} : memref<8x128xf32, #tpu.memory_space<vmem>>, vector<1x128xf32>,
    %8 = arith.addi %0, %c0_i32 : i32
    %9 = arith.index_cast %8 : i32 to index
    %10 = memref.load %arg2[%9] : memref<8xi32, #tpu.memory_space<smem>>
    %11 = arith.index_cast %10 : i32 to index
    %c0_1 = arith.constant 0 : index
    %12 = vector.load %arg3[%11, %c0_1] : memref<64x128xf32, #tpu.memory_space<vmem>>, vector<1x128xf32>
    %13 = arith.index_cast %c0_i32 : i32 to index
    %c0_2 = arith.constant 0 : index
    %14 = vector.load %arg6[%13, %c0_2] : memref<8x128xf32, #tpu.memory_space<vmem>>, vector<1x128xf32>
    tpu.vector_store %arg6[%13, %c0_2], %12 {strides = array<i32>} : memref<8x128xf32, #tpu.memory_space<vmem>>, vector<1x128xf32>,
    %c1_i32 = arith.constant 1 : i32
    %15 = arith.addi %0, %c1_i32 : i32
    %16 = arith.index_cast %15 : i32 to index
    %17 = memref.load %arg1[%16] : memref<8xi32, #tpu.memory_space<smem>>
    %18 = arith.index_cast %17 : i32 to index
    %c0_3 = arith.constant 0 : index
    %19 = vector.load %arg3[%18, %c0_3] : memref<64x128xf32, #tpu.memory_space<vmem>>, vector<1x128xf32>
    %20 = arith.index_cast %c1_i32 : i32 to index
    %c0_4 = arith.constant 0 : index
    %21 = vector.load %arg5[%20, %c0_4] : memref<8x128xf32, #tpu.memory_space<vmem>>, vector<1x128xf32>
    tpu.vector_store %arg5[%20, %c0_4], %19 {strides = array<i32>} : memref<8x128xf32, #tpu.memory_space<vmem>>, vector<1x128xf32>,
    %22 = arith.addi %0, %c1_i32 : i32
    %23 = arith.index_cast %22 : i32 to index
    %24 = memref.load %arg2[%23] : memref<8xi32, #tpu.memory_space<smem>>
    %25 = arith.index_cast %24 : i32 to index
    %c0_5 = arith.constant 0 : index
    %26 = vector.load %arg3[%25, %c0_5] : memref<64x128xf32, #tpu.memory_space<vmem>>, vector<1x128xf32>
    %27 = arith.index_cast %c1_i32 : i32 to index
    %c0_6 = arith.constant 0 : index
    %28 = vector.load %arg6[%27, %c0_6] : memref<8x128xf32, #tpu.memory_space<vmem>>, vector<1x128xf32>
    tpu.vector_store %arg6[%27, %c0_6], %26 {strides = array<i32>} : memref<8x128xf32, #tpu.memory_space<vmem>>, vector<1x128xf32>,
    %c2_i32 = arith.constant 2 : i32
    %29 = arith.addi %0, %c2_i32 : i32
    %30 = arith.index_cast %29 : i32 to index
    %31 = memref.load %arg1[%30] : memref<8xi32, #tpu.memory_space<smem>>
    %32 = arith.index_cast %31 : i32 to index
    %c0_7 = arith.constant 0 : index
    %33 = vector.load %arg3[%32, %c0_7] : memref<64x128xf32, #tpu.memory_space<vmem>>, vector<1x128xf32>
    %34 = arith.index_cast %c2_i32 : i32 to index
    %c0_8 = arith.constant 0 : index
    %35 = vector.load %arg5[%34, %c0_8] : memref<8x128xf32, #tpu.memory_space<vmem>>, vector<1x128xf32>
    tpu.vector_store %arg5[%34, %c0_8], %33 {strides = array<i32>} : memref<8x128xf32, #tpu.memory_space<vmem>>, vector<1x128xf32>,
    %36 = arith.addi %0, %c2_i32 : i32
    %37 = arith.index_cast %36 : i32 to index
    %38 = memref.load %arg2[%37] : memref<8xi32, #tpu.memory_space<smem>>
    %39 = arith.index_cast %38 : i32 to index
    %c0_9 = arith.constant 0 : index
    %40 = vector.load %arg3[%39, %c0_9] : memref<64x128xf32, #tpu.memory_space<vmem>>, vector<1x128xf32>
    %41 = arith.index_cast %c2_i32 : i32 to index
    %c0_10 = arith.constant 0 : index
    %42 = vector.load %arg6[%41, %c0_10] : memref<8x128xf32, #tpu.memory_space<vmem>>, vector<1x128xf32>
    tpu.vector_store %arg6[%41, %c0_10], %40 {strides = array<i32>} : memref<8x128xf32, #tpu.memory_space<vmem>>, vector<1x128xf32>,
    %c3_i32 = arith.constant 3 : i32
    %43 = arith.addi %0, %c3_i32 : i32
    %44 = arith.index_cast %43 : i32 to index
    %45 = memref.load %arg1[%44] : memref<8xi32, #tpu.memory_space<smem>>
    %46 = arith.index_cast %45 : i32 to index
    %c0_11 = arith.constant 0 : index
    %47 = vector.load %arg3[%46, %c0_11] : memref<64x128xf32, #tpu.memory_space<vmem>>, vector<1x128xf32>
    %48 = arith.index_cast %c3_i32 : i32 to index
    %c0_12 = arith.constant 0 : index
    %49 = vector.load %arg5[%48, %c0_12] : memref<8x128xf32, #tpu.memory_space<vmem>>, vector<1x128xf32>
    tpu.vector_store %arg5[%48, %c0_12], %47 {strides = array<i32>} : memref<8x128xf32, #tpu.memory_space<vmem>>, vector<1x128xf32>,
    %50 = arith.addi %0, %c3_i32 : i32
    %51 = arith.index_cast %50 : i32 to index
    %52 = memref.load %arg2[%51] : memref<8xi32, #tpu.memory_space<smem>>
    %53 = arith.index_cast %52 : i32 to index
    %c0_13 = arith.constant 0 : index
    %54 = vector.load %arg3[%53, %c0_13] : memref<64x128xf32, #tpu.memory_space<vmem>>, vector<1x128xf32>
    %55 = arith.index_cast %c3_i32 : i32 to index
    %c0_14 = arith.constant 0 : index
    %56 = vector.load %arg6[%55, %c0_14] : memref<8x128xf32, #tpu.memory_space<vmem>>, vector<1x128xf32>
    tpu.vector_store %arg6[%55, %c0_14], %54 {strides = array<i32>} : memref<8x128xf32, #tpu.memory_space<vmem>>, vector<1x128xf32>,
    %c4_i32 = arith.constant 4 : i32
    %57 = arith.addi %0, %c4_i32 : i32
    %58 = arith.index_cast %57 : i32 to index
    %59 = memref.load %arg1[%58] : memref<8xi32, #tpu.memory_space<smem>>
    %60 = arith.index_cast %59 : i32 to index
    %c0_15 = arith.constant 0 : index
    %61 = vector.load %arg3[%60, %c0_15] : memref<64x128xf32, #tpu.memory_space<vmem>>, vector<1x128xf32>
    %62 = arith.index_cast %c4_i32 : i32 to index
    %c0_16 = arith.constant 0 : index
    %63 = vector.load %arg5[%62, %c0_16] : memref<8x128xf32, #tpu.memory_space<vmem>>, vector<1x128xf32>
    tpu.vector_store %arg5[%62, %c0_16], %61 {strides = array<i32>} : memref<8x128xf32, #tpu.memory_space<vmem>>, vector<1x128xf32>,
    %64 = arith.addi %0, %c4_i32 : i32
    %65 = arith.index_cast %64 : i32 to index
    %66 = memref.load %arg2[%65] : memref<8xi32, #tpu.memory_space<smem>>
    %67 = arith.index_cast %66 : i32 to index
    %c0_17 = arith.constant 0 : index
    %68 = vector.load %arg3[%67, %c0_17] : memref<64x128xf32, #tpu.memory_space<vmem>>, vector<1x128xf32>
    %69 = arith.index_cast %c4_i32 : i32 to index
    %c0_18 = arith.constant 0 : index
    %70 = vector.load %arg6[%69, %c0_18] : memref<8x128xf32, #tpu.memory_space<vmem>>, vector<1x128xf32>
    tpu.vector_store %arg6[%69, %c0_18], %68 {strides = array<i32>} : memref<8x128xf32, #tpu.memory_space<vmem>>, vector<1x128xf32>,
    %c5_i32 = arith.constant 5 : i32
    %71 = arith.addi %0, %c5_i32 : i32
    %72 = arith.index_cast %71 : i32 to index
    %73 = memref.load %arg1[%72] : memref<8xi32, #tpu.memory_space<smem>>
    %74 = arith.index_cast %73 : i32 to index
    %c0_19 = arith.constant 0 : index
    %75 = vector.load %arg3[%74, %c0_19] : memref<64x128xf32, #tpu.memory_space<vmem>>, vector<1x128xf32>
    %76 = arith.index_cast %c5_i32 : i32 to index
    %c0_20 = arith.constant 0 : index
    %77 = vector.load %arg5[%76, %c0_20] : memref<8x128xf32, #tpu.memory_space<vmem>>, vector<1x128xf32>
    tpu.vector_store %arg5[%76, %c0_20], %75 {strides = array<i32>} : memref<8x128xf32, #tpu.memory_space<vmem>>, vector<1x128xf32>,
    %78 = arith.addi %0, %c5_i32 : i32
    %79 = arith.index_cast %78 : i32 to index
    %80 = memref.load %arg2[%79] : memref<8xi32, #tpu.memory_space<smem>>
    %81 = arith.index_cast %80 : i32 to index
    %c0_21 = arith.constant 0 : index
    %82 = vector.load %arg3[%81, %c0_21] : memref<64x128xf32, #tpu.memory_space<vmem>>, vector<1x128xf32>
    %83 = arith.index_cast %c5_i32 : i32 to index
    %c0_22 = arith.constant 0 : index
    %84 = vector.load %arg6[%83, %c0_22] : memref<8x128xf32, #tpu.memory_space<vmem>>, vector<1x128xf32>
    tpu.vector_store %arg6[%83, %c0_22], %82 {strides = array<i32>} : memref<8x128xf32, #tpu.memory_space<vmem>>, vector<1x128xf32>,
    %c6_i32 = arith.constant 6 : i32
    %85 = arith.addi %0, %c6_i32 : i32
    %86 = arith.index_cast %85 : i32 to index
    %87 = memref.load %arg1[%86] : memref<8xi32, #tpu.memory_space<smem>>
    %88 = arith.index_cast %87 : i32 to index
    %c0_23 = arith.constant 0 : index
    %89 = vector.load %arg3[%88, %c0_23] : memref<64x128xf32, #tpu.memory_space<vmem>>, vector<1x128xf32>
    %90 = arith.index_cast %c6_i32 : i32 to index
    %c0_24 = arith.constant 0 : index
    %91 = vector.load %arg5[%90, %c0_24] : memref<8x128xf32, #tpu.memory_space<vmem>>, vector<1x128xf32>
    tpu.vector_store %arg5[%90, %c0_24], %89 {strides = array<i32>} : memref<8x128xf32, #tpu.memory_space<vmem>>, vector<1x128xf32>,
    %92 = arith.addi %0, %c6_i32 : i32
    %93 = arith.index_cast %92 : i32 to index
    %94 = memref.load %arg2[%93] : memref<8xi32, #tpu.memory_space<smem>>
    %95 = arith.index_cast %94 : i32 to index
    %c0_25 = arith.constant 0 : index
    %96 = vector.load %arg3[%95, %c0_25] : memref<64x128xf32, #tpu.memory_space<vmem>>, vector<1x128xf32>
    %97 = arith.index_cast %c6_i32 : i32 to index
    %c0_26 = arith.constant 0 : index
    %98 = vector.load %arg6[%97, %c0_26] : memref<8x128xf32, #tpu.memory_space<vmem>>, vector<1x128xf32>
    tpu.vector_store %arg6[%97, %c0_26], %96 {strides = array<i32>} : memref<8x128xf32, #tpu.memory_space<vmem>>, vector<1x128xf32>,
    %c7_i32 = arith.constant 7 : i32
    %99 = arith.addi %0, %c7_i32 : i32
    %100 = arith.index_cast %99 : i32 to index
    %101 = memref.load %arg1[%100] : memref<8xi32, #tpu.memory_space<smem>>
    %102 = arith.index_cast %101 : i32 to index
    %c0_27 = arith.constant 0 : index
    %103 = vector.load %arg3[%102, %c0_27] : memref<64x128xf32, #tpu.memory_space<vmem>>, vector<1x128xf32>
    %104 = arith.index_cast %c7_i32 : i32 to index
    %c0_28 = arith.constant 0 : index
    %105 = vector.load %arg5[%104, %c0_28] : memref<8x128xf32, #tpu.memory_space<vmem>>, vector<1x128xf32>
    tpu.vector_store %arg5[%104, %c0_28], %103 {strides = array<i32>} : memref<8x128xf32, #tpu.memory_space<vmem>>, vector<1x128xf32>,
    %106 = arith.addi %0, %c7_i32 : i32
    %107 = arith.index_cast %106 : i32 to index
    %108 = memref.load %arg2[%107] : memref<8xi32, #tpu.memory_space<smem>>
    %109 = arith.index_cast %108 : i32 to index
    %c0_29 = arith.constant 0 : index
    %110 = vector.load %arg3[%109, %c0_29] : memref<64x128xf32, #tpu.memory_space<vmem>>, vector<1x128xf32>
    %111 = arith.index_cast %c7_i32 : i32 to index
    %c0_30 = arith.constant 0 : index
    %112 = vector.load %arg6[%111, %c0_30] : memref<8x128xf32, #tpu.memory_space<vmem>>, vector<1x128xf32>
    tpu.vector_store %arg6[%111, %c0_30], %110 {strides = array<i32>} : memref<8x128xf32, #tpu.memory_space<vmem>>, vector<1x128xf32>,
    %c8_i32_31 = arith.constant 8 : i32
    %c0_32 = arith.constant 0 : index
    %c0_33 = arith.constant 0 : index
    %113 = vector.load %arg5[%c0_32, %c0_33] : memref<8x128xf32, #tpu.memory_space<vmem>>, vector<8x128xf32>
    %c0_34 = arith.constant 0 : index
    %c0_35 = arith.constant 0 : index
    %114 = vector.load %arg6[%c0_34, %c0_35] : memref<8x128xf32, #tpu.memory_space<vmem>>, vector<8x128xf32>
    %115 = arith.mulf %113, %114 : vector<8x128xf32>
    %cst = arith.constant 1.000000e+00 : f32
    %116 = vector.broadcast %cst : f32 to vector<1x128xf32>
    "tpu.trace_start"() <{level = 10 : i32, message = "kd,nd->kn"}> : () -> ()
    %cst_36 = arith.constant dense<0.000000e+00> : vector<1x8xf32>
    %117 = tpu.matmul %116, %115, %cst_36 {dimension_numbers = #tpu.dot_dimension_numbers<[1], [1], [0], [0], [0, 0, 1, 0], [], []>} : vector<1x128xf32>, vector<8x128xf32>, vector<1x8xf32> -> vector<1x8xf32>
    "tpu.trace_stop"() : () -> ()
    %c0_37 = arith.constant 0 : index
    %c0_38 = arith.constant 0 : index
    %118 = vector.load %arg4[%c0_37, %c0_38] : memref<1x8xf32, #tpu.memory_space<vmem>>, vector<1x8xf32>
    tpu.vector_store %arg4[%c0_37, %c0_38], %117 {strides = array<i32>} : memref<1x8xf32, #tpu.memory_space<vmem>>, vector<1x8xf32>,
    return
  }
  func.func @transform_0(%arg0: i32, %arg1: memref<8xi32, #tpu.memory_space<smem>>, %arg2: memref<8xi32, #tpu.memory_space<smem>>) -> (i32, i32) {
    %c0_i32 = arith.constant 0 : i32
    %c0_i32_0 = arith.constant 0 : i32
    %c0_i32_1 = arith.constant 0 : i32
    return %c0_i32, %c0_i32_0 : i32, i32
  }
  func.func @transform_1(%arg0: i32, %arg1: memref<8xi32, #tpu.memory_space<smem>>, %arg2: memref<8xi32, #tpu.memory_space<smem>>) -> (i32, i32) {
    %c0_i32 = arith.constant 0 : i32
    %c0_i32_0 = arith.constant 0 : i32
    return %c0_i32, %arg0 : i32, i32
  }
}

</mosaic_0001>

<bundles_post_ra>
// kernel: tpu_custom_call.1
= control target key start
LH: loop header
LB: loop body
LE: loop exit
PB: predicated region body
PF: predicated region fallthrough
CT: control target
= control target key end

     0   :  { %s269_s18 = smov [#allocation5]   ;;  %s270_s19 = smov [#allocation6]   ;;  %s308_s0 = inlined_call_operand.hbm [shape: s32[8], index: 0, kind: input, shape index: {}]   ;;  %s309_s2 = inlined_call_operand.hbm [shape: f32[64,128], index: 2, kind: input, shape index: {}]   ;;  %s310_s3 = inlined_call_operand.hbm [shape: f32[1,8], index: 3, kind: output, shape index: {}]   ;;  %s311_s1 = inlined_call_operand.hbm [shape: s32[8], index: 1, kind: input, shape index: {}]  }
   0x1   :  { %s9_s14 = sshll.u32 %s308_s0, 4  ;;  %s14_s17 = sshll.u32 %s311_s1, 4  ;;  %s10_s14 = int_to_ptr.hbm [resolvable:$true] %s9_s14  ;;  %s15_s17 = int_to_ptr.hbm [resolvable:$true] %s14_s17 }
   0x2   :  { %12 = dma.hbm_to_smem %s10_s14, 16, %s269_s18, [#allocation4] }
   0x3   :  { %17 = dma.hbm_to_smem %s15_s17, 16, %s270_s19, [#allocation4] }
   0x4   :  { %263 = dma.done.wait [#allocation4], 32 }
   0x5   :  { %264 = vsyncadd [#allocation4], 4294967264 }
   0x6   :  { %20 = sfence }
   0x7   :  { %21 = vsyncpa [#allocation8], 0 }
   0x8   :  { %22 = vsyncpa [#allocation9], 0  ;;  %s27_s22 = sshll.u32 %s309_s2, 4  ;;  %s271_s0 = smov [#allocation7]   ;;  %s28_s22 = int_to_ptr.hbm [resolvable:$true] %s27_s22 }
   0x9   :  { %s29_s23 = sshll.u32 %s271_s0, 4  ;;  %s272_s1 = smov 128   ;;  %s30_s23 = int_to_ptr.vmem [resolvable:$true] %s29_s23 }
   0xa   :  { %s273_s24 = smov 8  }
   0xb   :  { %35 = dma.hbm_to_vmem [thread:$0]  %s28_s22, 1024, %s30_s23, [#allocation8], %s272_s1, %s272_s1, %s273_s24  }
   0xc   :  { %265 = dma.done.wait [#allocation8], 1024  }
   0xd   :  { %266 = vsyncadd [#allocation8], 4294966272  ;;  %s41_s25 = sld [smem:[#allocation5]]  ;;  %v274_v19 = vmov 1.0   ;;  %vm135_vm0 = vcmask 57344  }
   0xe   :  { %s45_s26 = sld [smem:[#allocation6]] }
   0xf   :  { %s170_s27 = sld [smem:[#allocation5 + $0x1]] }
  0x10   :  { %s171_s28 = sld [smem:[#allocation6 + $0x1]] }
  0x11   :  { %s172_s29 = sld [smem:[#allocation5 + $0x2]] }
  0x12   :  { %s173_s30 = sld [smem:[#allocation6 + $0x2]] }
  0x13   :  { %s174_s4 = sld [smem:[#allocation5 + $0x3]]  ;;  %s42_s5 = scalar_lea.vmem [#allocation7], %s41_s25 }
  0x14   :  { %v43_v0 = vld [vmem:[%s42_s5] sm:$0x1]  ;;  %s175_s6 = sld [smem:[#allocation6 + $0x3]]  ;;  %s46_s2 = scalar_lea.vmem [#allocation7], %s45_s26 }
  0x15   :  { %44 = vst [vmem:[#allocation2] sm:$0x1] %v43_v0  ;;  %v47_v1 = vld [vmem:[%s46_s2] sm:$0x1]  ;;  %s51_s7 = scalar_lea.vmem [#allocation7], %s170_s27  ;;  %s176_s13 = sld [smem:[#allocation5 + $0x4]] }
  0x16   :  { %48 = vst [vmem:[#allocation3] sm:$0x1] %v47_v1  ;;  %v52_v2 = vld [vmem:[%s51_s7] sm:$0x1]  ;;  %s55_s8 = scalar_lea.vmem [#allocation7], %s171_s28  ;;  %s177_s14 = sld [smem:[#allocation6 + $0x4]] }
  0x17   :  { %53 = vst [vmem:[#allocation2 + $0x1] sm:$0x1] %v52_v2  ;;  %v56_v3 = vld [vmem:[%s55_s8] sm:$0x1]  ;;  %s60_s9 = scalar_lea.vmem [#allocation7], %s172_s29  ;;  %s178_s15 = sld [smem:[#allocation5 + $0x5]] }
  0x18   :  { %57 = vst [vmem:[#allocation3 + $0x1] sm:$0x1] %v56_v3  ;;  %v61_v4 = vld [vmem:[%s60_s9] sm:$0x1]  ;;  %s64_s10 = scalar_lea.vmem [#allocation7], %s173_s30  ;;  %s179_s16 = sld [smem:[#allocation6 + $0x5]] }
  0x19   :  { %62 = vst [vmem:[#allocation2 + $0x2] sm:$0x1] %v61_v4  ;;  %v65_v5 = vld [vmem:[%s64_s10] sm:$0x1]  ;;  %s69_s11 = scalar_lea.vmem [#allocation7], %s174_s4  ;;  %s180_s17 = sld [smem:[#allocation5 + $0x6]] }
  0x1a   :  { %66 = vst [vmem:[#allocation3 + $0x2] sm:$0x1] %v65_v5  ;;  %v70_v6 = vld [vmem:[%s69_s11] sm:$0x1]  ;;  %s73_s12 = scalar_lea.vmem [#allocation7], %s175_s6  ;;  %s181_s18 = sld [smem:[#allocation6 + $0x6]] }
  0x1b   :  { %71 = vst [vmem:[#allocation2 + $0x3] sm:$0x1] %v70_v6  ;;  %v74_v7 = vld [vmem:[%s73_s12] sm:$0x1]  ;;  %s182_s19 = sld [smem:[#allocation5 + $0x7]]  ;;  %s78_s20 = scalar_lea.vmem [#allocation7], %s176_s13 }
  0x1c   :  { %75 = vst [vmem:[#allocation3 + $0x3] sm:$0x1] %v74_v7  ;;  %v79_v8 = vld [vmem:[%s78_s20] sm:$0x1]  ;;  %s183_s21 = sld [smem:[#allocation6 + $0x7]]  ;;  %s82_s22 = scalar_lea.vmem [#allocation7], %s177_s14 }
  0x1d   :  { %80 = vst [vmem:[#allocation2 + $0x4] sm:$0x1] %v79_v8  ;;  %v83_v9 = vld [vmem:[%s82_s22] sm:$0x1]  ;;  %s87_s0 = scalar_lea.vmem [#allocation7], %s178_s15  ;;  %s275_s27 = smov [#allocation10]  }
  0x1e   :  { %84 = vst [vmem:[#allocation3 + $0x4] sm:$0x1] %v83_v9  ;;  %v88_v10 = vld [vmem:[%s87_s0] sm:$0x1]  ;;  %s91_s23 = scalar_lea.vmem [#allocation7], %s179_s16  ;;  %s142_s28 = sshll.u32 %s275_s27, 4  ;;  %s143_s28 = int_to_ptr.vmem [resolvable:$true] %s142_s28 }
  0x1f   :  { %89 = vst [vmem:[#allocation2 + $0x5] sm:$0x1] %v88_v10  ;;  %v92_v11 = vld [vmem:[%s91_s23] sm:$0x1]  ;;  %s96_s1 = scalar_lea.vmem [#allocation7], %s180_s17  ;;  %s144_s4 = sshll.u32 %s310_s3, 4  ;;  %s145_s4 = int_to_ptr.hbm [resolvable:$true] %s144_s4 }
  0x20   :  { %93 = vst [vmem:[#allocation3 + $0x5] sm:$0x1] %v92_v11  ;;  %v97_v12 = vld [vmem:[%s96_s1] sm:$0x1]  ;;  %s100_s24 = scalar_lea.vmem [#allocation7], %s181_s18 }
  0x21   :  { %98 = vst [vmem:[#allocation2 + $0x6] sm:$0x1] %v97_v12  ;;  %v101_v13 = vld [vmem:[%s100_s24] sm:$0x1]  ;;  %s105_s25 = scalar_lea.vmem [#allocation7], %s182_s19 }
  0x22   :  { %102 = vst [vmem:[#allocation3 + $0x6] sm:$0x1] %v101_v13  ;;  %v106_v14 = vld [vmem:[%s105_s25] sm:$0x1]  ;;  %s109_s26 = scalar_lea.vmem [#allocation7], %s183_s21 }
  0x23   :  { %107 = vst [vmem:[#allocation2 + $0x7] sm:$0x1] %v106_v14  ;;  %v110_v15 = vld [vmem:[%s109_s26] sm:$0x1] }
  0x24   :  { %111 = vst [vmem:[#allocation3 + $0x7] sm:$0x1] %v110_v15 }
  0x2a   :  { %v112_v16 = vld [vmem:[#allocation2] sm:$0xff] }
  0x2b   :  { %v113_v17 = vld [vmem:[#allocation3] sm:$0xff] }
  0x2c   :  { %v114_v18 = vmul.f32 %v113_v17, %v112_v16 }
  0x2e   :  { %130 = vmatpush.xpose.msra.mxu0 %v114_v18 }
  0x31   :  { %131 = vmatmul.f32.vlgmr.msra.gmra.mxu0 %v274_v19 }
  0xae   :  { %v132_v20 = vpop.f32.mrf.mxu0 }
  0xaf   :  { %136 = vst.msk [vmem:[#allocation10] sm:$0x1] %vm135_vm0, %v132_v20 }
  0xb0   :  { %147 = dma.vmem_to_hbm [thread:$0]  %s143_s28, 16, %s145_s4, [#allocation9]  }
  0xb1   :  { %267 = dma.done.wait [#allocation9], 16  }
  0xb2   :  { %268 = vsyncadd [#allocation9], 4294967280 }
  0xb3   :  { %152 = vsyncpa [#allocation8], 1 }
  0xb4   :  { %153 = vsyncpa [#allocation9], 1 }

</bundles_post_ra>
